<compile_context>
chip_gen: v7x
topology: tpu7x:2x2x1
jax: 0.10.0
libtpu: 0.0.40
codegen_flags: <defaults>
</compile_context>

<pallas_src>
import functools

import jax
import jax.numpy as jnp
from jax.experimental import pallas as pl
from jax.experimental.pallas import tpu as pltpu

# Hyperparameters (hp.*), consistent with the module.
INPUT_SIZE = 32                       # hp.ref_gru_hidden
OUTPUT_SIZE = 32                      # hp.gst_size
N_TOKEN = 8                           # hp.n_style_token
N_HEAD = 4                            # hp.n_style_attn_head
TOKEN_SIZE = OUTPUT_SIZE // N_HEAD    # 8
TEMPERATURE = float(TOKEN_SIZE) ** 0.5

PACK = 128 // INPUT_SIZE              # 4 batch rows packed per 128-lane row
PACKED_IN = PACK * INPUT_SIZE         # 128
PACKED_OUT = PACK * OUTPUT_SIZE       # 128
TILE_R_DEFAULT = 1024                 # packed rows per grid step (= 4096 batch rows)


def _round_up(a, b):
    return (a + b - 1) // b * b


def _block_diag(blocks):
    """Block-diagonal matrix from a list of equally-shaped 2-D blocks."""
    r, c = blocks[0].shape
    n = len(blocks)
    out = jnp.zeros((n * r, n * c), dtype=jnp.float32)
    for i, b in enumerate(blocks):
        out = out.at[i * r:(i + 1) * r, i * c:(i + 1) * c].set(b)
    return out


def style_attention_kernel(x_ref, wq_ref, bq_ref, k_ref, ones_ref, v_ref, o_ref):
    """One lane-packed batch tile: all matmuls are (tile, 128) @ (128, 128)."""
    x = x_ref[...]                                                        # (tile, 128)
    q = jnp.dot(x, wq_ref[...], preferred_element_type=jnp.float32) + bq_ref[...]
    s = jnp.dot(q, k_ref[...], preferred_element_type=jnp.float32)       # scores / temp
    # Segmented (per pack-slot, per head) softmax over the 8 tokens.  The row
    # maximum is uniform within every 8-lane segment, so subtracting it is an
    # exact stabilization of each segment's softmax.
    s = s - jnp.max(s, axis=-1, keepdims=True)
    e = jnp.exp(s)
    den = jnp.dot(e, ones_ref[...], preferred_element_type=jnp.float32)  # segment sums
    p = e * pl.reciprocal(den, approx=True)
    o_ref[...] = jnp.dot(p, v_ref[...],
                         preferred_element_type=jnp.float32).astype(o_ref.dtype)


@functools.partial(jax.jit, static_argnames=("tile_r",))
def style_attention(inputs, tokens, wq, bq, wk, bk, wv, bv, *, tile_r=TILE_R_DEFAULT):
    """inputs (bs, 32); weights stored [in, out]; returns (bs, 32) f32."""
    bs = inputs.shape[0]
    f32 = jnp.float32

    # ---- batch-independent token-side precompute (plain JAX, once per call) ----
    t = jnp.tanh(tokens.astype(f32))                                      # (n_tok, ts)
    k = t @ wk.astype(f32) + bk.astype(f32)                               # (n_tok, out)
    v = t @ wv.astype(f32) + bv.astype(f32)                               # (n_tok, out)
    kh = k.reshape(N_TOKEN, N_HEAD, TOKEN_SIZE).transpose(1, 2, 0) / TEMPERATURE  # (H, ts, n)
    vh = v.reshape(N_TOKEN, N_HEAD, TOKEN_SIZE).transpose(1, 0, 2)                # (H, n, ts)
    k32 = _block_diag([kh[h] for h in range(N_HEAD)])                     # (32, 32)
    v32 = _block_diag([vh[h] for h in range(N_HEAD)])                     # (32, 32)
    eye_p = jnp.eye(PACK, dtype=f32)
    k_big = jnp.kron(eye_p, k32)                                          # (128, 128)
    v_big = jnp.kron(eye_p, v32)                                          # (128, 128)
    wq_big = jnp.kron(eye_p, wq.astype(f32))                              # (128, 128)
    bq_big = jnp.tile(bq.astype(f32), (PACK,)).reshape(1, PACKED_OUT)     # (1, 128)
    ones_big = jnp.kron(jnp.eye(PACK * N_HEAD, dtype=f32),
                        jnp.ones((TOKEN_SIZE, TOKEN_SIZE), f32))          # (128, 128)

    # ---- lane-pack the batch: 4 rows of 32 features -> 1 row of 128 lanes ----
    pad_b = (-bs) % PACK
    x = jnp.pad(inputs.astype(f32), ((0, pad_b), (0, 0)))
    n_rows = x.shape[0] // PACK
    x_packed = x.reshape(n_rows, PACKED_IN)

    tile = min(tile_r, max(8, _round_up(n_rows, 8)))                      # sublane-aligned
    pad_r = (-n_rows) % tile
    x_packed = jnp.pad(x_packed, ((0, pad_r), (0, 0)))
    n_padded = x_packed.shape[0]
    grid = (n_padded // tile,)

    resident = lambda i: (0, 0)  # constants: same block every step -> stay in VMEM
    out_packed = pl.pallas_call(
        style_attention_kernel,
        out_shape=jax.ShapeDtypeStruct((n_padded, PACKED_OUT), f32),
        grid=grid,
        in_specs=[
            pl.BlockSpec((tile, PACKED_IN), lambda i: (i, 0)),            # streamed
            pl.BlockSpec((PACKED_IN, PACKED_OUT), resident),              # Wq block-diag
            pl.BlockSpec((1, PACKED_OUT), resident),                      # bq tiled
            pl.BlockSpec((PACKED_OUT, PACKED_OUT), resident),             # K^T/temp block-diag
            pl.BlockSpec((PACKED_OUT, PACKED_OUT), resident),             # segment-sum ones
            pl.BlockSpec((PACKED_OUT, PACKED_OUT), resident),             # V block-diag
        ],
        out_specs=pl.BlockSpec((tile, PACKED_OUT), lambda i: (i, 0)),
        compiler_params=pltpu.CompilerParams(
            dimension_semantics=("parallel",)),
    )(x_packed, wq_big, bq_big, k_big, ones_big, v_big)

    return out_packed[:n_rows].reshape(n_rows * PACK, OUTPUT_SIZE)[:bs]


def style_attention_ref(inputs, tokens, wq, bq, wk, bk, wv, bv):
    """Pure-JAX reference mirroring the PyTorch forward (default path)."""
    t = jnp.tanh(tokens)
    q = inputs @ wq + bq
    k = t @ wk + bk
    v = t @ wv + bv
    bs = inputs.shape[0]
    qh = q.reshape(bs, N_HEAD, TOKEN_SIZE)
    kh = k.reshape(N_TOKEN, N_HEAD, TOKEN_SIZE)
    vh = v.reshape(N_TOKEN, N_HEAD, TOKEN_SIZE)
    scores = jnp.einsum("bht,nht->bhn", qh, kh) / TEMPERATURE
    scores = jax.nn.softmax(scores, axis=-1)
    out = jnp.einsum("bhn,nht->bht", scores, vh)
    return out.reshape(bs, OUTPUT_SIZE)


if __name__ == "__main__":
    key = jax.random.PRNGKey(0)
    k_x, k_tok, k_wq, k_bq, k_wk, k_bk, k_wv, k_bv, k_x2 = jax.random.split(key, 9)

    # nn.Linear default init ~ U(-1/sqrt(fan_in), 1/sqrt(fan_in)); stored [in, out].
    def lin_init(kw, kb, fan_in, fan_out):
        bound = 1.0 / (fan_in ** 0.5)
        w = jax.random.uniform(kw, (fan_in, fan_out), jnp.float32, -bound, bound)
        b = jax.random.uniform(kb, (fan_out,), jnp.float32, -bound, bound)
        return w, b

    tokens = jax.random.normal(k_tok, (N_TOKEN, TOKEN_SIZE), dtype=jnp.float32)  # init.normal_
    wq, bq = lin_init(k_wq, k_bq, INPUT_SIZE, OUTPUT_SIZE)
    wk, bk = lin_init(k_wk, k_bk, TOKEN_SIZE, OUTPUT_SIZE)
    wv, bv = lin_init(k_wv, k_bv, TOKEN_SIZE, OUTPUT_SIZE)

    # Small batch (module's typical usage).
    bs = 2
    inputs = jax.random.normal(k_x, (bs, INPUT_SIZE), dtype=jnp.float32)
    out = jax.block_until_ready(style_attention(inputs, tokens, wq, bq, wk, bk, wv, bv))
    ref = style_attention_ref(inputs, tokens, wq, bq, wk, bk, wv, bv)
    assert out.shape == (bs, OUTPUT_SIZE)
    assert jnp.allclose(out, ref, rtol=1e-2, atol=1e-2), "mismatch vs reference (bs=2)"

    # Batch not divisible by the pack factor: exercises the padding/tiling path.
    bs2 = 37
    inputs2 = jax.random.normal(k_x2, (bs2, INPUT_SIZE), dtype=jnp.float32)
    out2 = jax.block_until_ready(style_attention(inputs2, tokens, wq, bq, wk, bk, wv, bv))
    ref2 = style_attention_ref(inputs2, tokens, wq, bq, wk, bk, wv, bv)
    assert out2.shape == (bs2, OUTPUT_SIZE)
    assert jnp.allclose(out2, ref2, rtol=1e-2, atol=1e-2), "mismatch vs reference (bs=37)"

    print("KERNEL_OK")
</pallas_src>

<mosaic_0001>
module attributes {stable_mosaic.version = 11 : i64} {
  func.func @style_attention_kernel(%arg0: i32, %arg1: memref<8x128xf32, #tpu.memory_space<vmem>>, %arg2: memref<128x128xf32, #tpu.memory_space<vmem>>, %arg3: memref<1x128xf32, #tpu.memory_space<vmem>>, %arg4: memref<128x128xf32, #tpu.memory_space<vmem>>, %arg5: memref<128x128xf32, #tpu.memory_space<vmem>>, %arg6: memref<128x128xf32, #tpu.memory_space<vmem>>, %arg7: memref<8x128xf32, #tpu.memory_space<vmem>>) attributes {dimension_semantics = [#tpu.dimension_semantics<parallel>], iteration_bounds = array<i64: 1>, scalar_prefetch = 0 : i64, scratch_operands = 0 : i64, tpu.core_type = #tpu.core_type<tc>, window_params = [{transform_indices = @transform_0, window_bounds = array<i64: 8, 128>}, {pipeline_mode = #tpu.pipeline_mode<synchronous>, transform_indices = @transform_1, window_bounds = array<i64: 128, 128>}, {pipeline_mode = #tpu.pipeline_mode<synchronous>, transform_indices = @transform_2, window_bounds = array<i64: 1, 128>}, {pipeline_mode = #tpu.pipeline_mode<synchronous>, transform_indices = @transform_3, window_bounds = array<i64: 128, 128>}, {pipeline_mode = #tpu.pipeline_mode<synchronous>, transform_indices = @transform_4, window_bounds = array<i64: 128, 128>}, {pipeline_mode = #tpu.pipeline_mode<synchronous>, transform_indices = @transform_5, window_bounds = array<i64: 128, 128>}, {transform_indices = @transform_6, window_bounds = array<i64: 8, 128>}]} {
    %c0 = arith.constant 0 : index
    %c0_0 = arith.constant 0 : index
    %0 = vector.load %arg1[%c0, %c0_0] : memref<8x128xf32, #tpu.memory_space<vmem>>, vector<8x128xf32>
    %c0_1 = arith.constant 0 : index
    %c0_2 = arith.constant 0 : index
    %1 = vector.load %arg2[%c0_1, %c0_2] : memref<128x128xf32, #tpu.memory_space<vmem>>, vector<128x128xf32>
    %cst = arith.constant dense<0.000000e+00> : vector<8x128xf32>
    %2 = tpu.matmul %0, %1, %cst {dimension_numbers = #tpu.dot_dimension_numbers<[1], [0], [0], [1], [0, 0, 1, 1], [], []>} : vector<8x128xf32>, vector<128x128xf32>, vector<8x128xf32> -> vector<8x128xf32>
    %c0_3 = arith.constant 0 : index
    %c0_4 = arith.constant 0 : index
    %3 = vector.load %arg3[%c0_3, %c0_4] : memref<1x128xf32, #tpu.memory_space<vmem>>, vector<1x128xf32>
    %4 = vector.broadcast %3 : vector<1x128xf32> to vector<8x128xf32>
    %5 = arith.addf %2, %4 : vector<8x128xf32>
    %c0_5 = arith.constant 0 : index
    %c0_6 = arith.constant 0 : index
    %6 = vector.load %arg4[%c0_5, %c0_6] : memref<128x128xf32, #tpu.memory_space<vmem>>, vector<128x128xf32>
    %cst_7 = arith.constant dense<0.000000e+00> : vector<8x128xf32>
    %7 = tpu.matmul %5, %6, %cst_7 {dimension_numbers = #tpu.dot_dimension_numbers<[1], [0], [0], [1], [0, 0, 1, 1], [], []>} : vector<8x128xf32>, vector<128x128xf32>, vector<8x128xf32> -> vector<8x128xf32>
    %cst_8 = arith.constant dense<0xFF800000> : vector<8xf32>
    %8 = vector.multi_reduction <maximumf>, %7, %cst_8 [1] : vector<8x128xf32> to vector<8xf32>
    %9 = vector.shape_cast %8 : vector<8xf32> to vector<8x1xf32>
    %10 = vector.broadcast %9 : vector<8x1xf32> to vector<8x128xf32>
    %11 = arith.subf %7, %10 : vector<8x128xf32>
    %12 = math.exp %11 : vector<8x128xf32>
    %c0_9 = arith.constant 0 : index
    %c0_10 = arith.constant 0 : index
    %13 = vector.load %arg5[%c0_9, %c0_10] : memref<128x128xf32, #tpu.memory_space<vmem>>, vector<128x128xf32>
    %cst_11 = arith.constant dense<0.000000e+00> : vector<8x128xf32>
    %14 = tpu.matmul %12, %13, %cst_11 {dimension_numbers = #tpu.dot_dimension_numbers<[1], [0], [0], [1], [0, 0, 1, 1], [], []>} : vector<8x128xf32>, vector<128x128xf32>, vector<8x128xf32> -> vector<8x128xf32>
    %15 = tpu.reciprocal %14 {approx = true} : vector<8x128xf32> -> vector<8x128xf32>
    %16 = arith.mulf %12, %15 : vector<8x128xf32>
    %c0_12 = arith.constant 0 : index
    %c0_13 = arith.constant 0 : index
    %17 = vector.load %arg6[%c0_12, %c0_13] : memref<128x128xf32, #tpu.memory_space<vmem>>, vector<128x128xf32>
    %cst_14 = arith.constant dense<0.000000e+00> : vector<8x128xf32>
    %18 = tpu.matmul %16, %17, %cst_14 {dimension_numbers = #tpu.dot_dimension_numbers<[1], [0], [0], [1], [0, 0, 1, 1], [], []>} : vector<8x128xf32>, vector<128x128xf32>, vector<8x128xf32> -> vector<8x128xf32>
    %c0_15 = arith.constant 0 : index
    %c0_16 = arith.constant 0 : index
    %19 = vector.load %arg7[%c0_15, %c0_16] : memref<8x128xf32, #tpu.memory_space<vmem>>, vector<8x128xf32>
    tpu.vector_store %arg7[%c0_15, %c0_16], %18 {strides = array<i32>} : memref<8x128xf32, #tpu.memory_space<vmem>>, vector<8x128xf32>,
    return
  }
  func.func @transform_0(%arg0: i32) -> (i32, i32) {
    %c0_i32 = arith.constant 0 : i32
    %c0_i32_0 = arith.constant 0 : i32
    return %arg0, %c0_i32 : i32, i32
  }
  func.func @transform_1(%arg0: i32) -> (i32, i32) {
    %c0_i32 = arith.constant 0 : i32
    %c0_i32_0 = arith.constant 0 : i32
    %c0_i32_1 = arith.constant 0 : i32
    return %c0_i32, %c0_i32_0 : i32, i32
  }
  func.func @transform_2(%arg0: i32) -> (i32, i32) {
    %c0_i32 = arith.constant 0 : i32
    %c0_i32_0 = arith.constant 0 : i32
    %c0_i32_1 = arith.constant 0 : i32
    return %c0_i32, %c0_i32_0 : i32, i32
  }
  func.func @transform_3(%arg0: i32) -> (i32, i32) {
    %c0_i32 = arith.constant 0 : i32
    %c0_i32_0 = arith.constant 0 : i32
    %c0_i32_1 = arith.constant 0 : i32
    return %c0_i32, %c0_i32_0 : i32, i32
  }
  func.func @transform_4(%arg0: i32) -> (i32, i32) {
    %c0_i32 = arith.constant 0 : i32
    %c0_i32_0 = arith.constant 0 : i32
    %c0_i32_1 = arith.constant 0 : i32
    return %c0_i32, %c0_i32_0 : i32, i32
  }
  func.func @transform_5(%arg0: i32) -> (i32, i32) {
    %c0_i32 = arith.constant 0 : i32
    %c0_i32_0 = arith.constant 0 : i32
    %c0_i32_1 = arith.constant 0 : i32
    return %c0_i32, %c0_i32_0 : i32, i32
  }
  func.func @transform_6(%arg0: i32) -> (i32, i32) {
    %c0_i32 = arith.constant 0 : i32
    %c0_i32_0 = arith.constant 0 : i32
    return %arg0, %c0_i32 : i32, i32
  }
}

</mosaic_0001>

<bundles_post_ra>
// kernel: tile.8
= control target key start
LH: loop header
LB: loop body
LE: loop exit
PB: predicated region body
PF: predicated region fallthrough
CT: control target
= control target key end

     0   :  { %s22_s0 = inlined_call_operand.vmem [shape: f32[32], index: 0, kind: input, shape index: {}]   ;;  %s23_s1 = inlined_call_operand.vmem [shape: f32[4,32], index: 1, kind: output, shape index: {}]  }
   0x1   :  { %v4_v0 = vld [vmem:[%s22_s0] ss:$0 sm:$0xff] }
   0x2   :  { %5 = vst [vmem:[%s23_s1] sm:$0xf] %v4_v0 }

// kernel: style_attention.1
= control target key start
LH: loop header
LB: loop body
LE: loop exit
PB: predicated region body
PF: predicated region fallthrough
CT: control target
= control target key end

     0   :  { %v699_v0 = vmov 0.0|0.0   ;;  %vm700_vm0 = vmmov 0   ;;  %v701_v4 = vmov 0.0   ;;  %s978_s1 = inlined_call_operand.vmem [shape: f32[128,128], index: 1, kind: input, shape index: {}]   ;;  %s979_s3 = inlined_call_operand.vmem [shape: f32[128,128], index: 3, kind: input, shape index: {}]   ;;  %s980_s0 = inlined_call_operand.vmem [shape: f32[8,128], index: 0, kind: input, shape index: {}]   ;;  %s981_s2 = inlined_call_operand.vmem [shape: f32[1,128], index: 2, kind: input, shape index: {}]   ;;  %s982_s4 = inlined_call_operand.vmem [shape: f32[128,128], index: 4, kind: input, shape index: {}]   ;;  %s983_s5 = inlined_call_operand.vmem [shape: f32[128,128], index: 5, kind: input, shape index: {}]   ;;  %s984_s6 = inlined_call_operand.vmem [shape: f32[8,128], index: 6, kind: output, shape index: {}]  }
   0x1   :  { %596 = vmatprep.subr.bf16.mxu0 %v699_v0  ;;  %v24_v1 = vld [vmem:[%s978_s1] sm:$0xff]  ;;  %v25_v2 = vld [vmem:[%s978_s1 + $0x8] sm:$0xff]  ;;  %v26_v3 = vld [vmem:[%s978_s1 + $0x10] sm:$0xff]  ;;  %488 = vmatprep.mubr.msk.f32.mxu0 %vm700_vm0, %v701_v4 }
   0x2   :  { %v597_v5 = vpack.c.bf16 %v25_v2, %v24_v1  ;;  %v27_v6 = vld [vmem:[%s978_s1 + $0x18] sm:$0xff]  ;;  %620 = vmatprep.subr.bf16.mxu1 %v699_v0  ;;  %523 = vmatprep.mubr.msk.f32.mxu1 %vm700_vm0, %v701_v4  ;;  %v28_v8 = vld [vmem:[%s978_s1 + $0x20] sm:$0xff]  ;;  %v29_v9 = vld [vmem:[%s978_s1 + $0x28] sm:$0xff] }
   0x3   :  { %v600_v7 = vpack.c.bf16 %v27_v6, %v26_v3  ;;  %v117_v10 = vld [vmem:[%s979_s3] sm:$0xff]  ;;  %v118_v11 = vld [vmem:[%s979_s3 + $0x8] sm:$0xff]  ;;  %v119_v12 = vld [vmem:[%s979_s3 + $0x10] sm:$0xff]  ;;  %v603_v14 = vpack.c.bf16 %v29_v9, %v28_v8 }
   0x4   :  { %598 = vmatpush3.bf16.msra.mxu0 %v597_v5  ;;  %v120_v13 = vld [vmem:[%s979_s3 + $0x18] sm:$0xff]  ;;  %v621_v15 = vpack.c.bf16 %v118_v11, %v117_v10  ;;  %v30_v16 = vld [vmem:[%s978_s1 + $0x30] sm:$0xff]  ;;  %v121_v19 = vld [vmem:[%s979_s3 + $0x20] sm:$0xff] }
   0x5   :  { %599 = vmatprep.subr.bf16.mxu0 %v699_v0  ;;  %v31_v17 = vld [vmem:[%s978_s1 + $0x38] sm:$0xff]  ;;  %v624_v18 = vpack.c.bf16 %v120_v13, %v119_v12  ;;  %v122_v20 = vld [vmem:[%s979_s3 + $0x28] sm:$0xff]  ;;  %v32_v22 = vld [vmem:[%s978_s1 + $0x40] sm:$0xff] }
   0x6   :  { %622 = vmatpush3.bf16.msra.mxu1 %v621_v15  ;;  %v606_v21 = vpack.c.bf16 %v31_v17, %v30_v16  ;;  %v33_v23 = vld [vmem:[%s978_s1 + $0x48] sm:$0xff]  ;;  %v627_v24 = vpack.c.bf16 %v122_v20, %v121_v19  ;;  %v123_v25 = vld [vmem:[%s979_s3 + $0x30] sm:$0xff]  ;;  %v124_v26 = vld [vmem:[%s979_s3 + $0x38] sm:$0xff] }
   0x7   :  { %623 = vmatprep.subr.bf16.mxu1 %v699_v0  ;;  %v609_v27 = vpack.c.bf16 %v33_v23, %v32_v22  ;;  %v34_v28 = vld [vmem:[%s978_s1 + $0x50] sm:$0xff]  ;;  %v35_v29 = vld [vmem:[%s978_s1 + $0x58] sm:$0xff]  ;;  %v630_v30 = vpack.c.bf16 %v124_v26, %v123_v25  ;;  %v125_v31 = vld [vmem:[%s979_s3 + $0x40] sm:$0xff] }
   0x8   :  { %601 = vmatpush3.bf16.msra.mxu0 %v600_v7  ;;  %v126_v32 = vld [vmem:[%s979_s3 + $0x48] sm:$0xff]  ;;  %v612_v33 = vpack.c.bf16 %v35_v29, %v34_v28  ;;  %v36_v34 = vld [vmem:[%s978_s1 + $0x60] sm:$0xff]  ;;  %v127_v37 = vld [vmem:[%s979_s3 + $0x50] sm:$0xff] }
   0x9   :  { %602 = vmatprep.subr.bf16.mxu0 %v699_v0  ;;  %v37_v35 = vld [vmem:[%s978_s1 + $0x68] sm:$0xff]  ;;  %v633_v36 = vpack.c.bf16 %v126_v32, %v125_v31  ;;  %v128_v38 = vld [vmem:[%s979_s3 + $0x58] sm:$0xff]  ;;  %v38_v40 = vld [vmem:[%s978_s1 + $0x70] sm:$0xff] }
   0xa   :  { %625 = vmatpush3.bf16.msra.mxu1 %v624_v18  ;;  %v615_v39 = vpack.c.bf16 %v37_v35, %v36_v34  ;;  %v39_v41 = vld [vmem:[%s978_s1 + $0x78] sm:$0xff]  ;;  %v636_v42 = vpack.c.bf16 %v128_v38, %v127_v37  ;;  %v129_v43 = vld [vmem:[%s979_s3 + $0x60] sm:$0xff]  ;;  %v130_v44 = vld [vmem:[%s979_s3 + $0x68] sm:$0xff] }
   0xb   :  { %626 = vmatprep.subr.bf16.mxu1 %v699_v0  ;;  %v618_v45 = vpack.c.bf16 %v39_v41, %v38_v40  ;;  %v639_v46 = vpack.c.bf16 %v130_v44, %v129_v43  ;;  %v23_v47 = vld [vmem:[%s980_s0] sm:$0xff]  ;;  %v131_v48 = vld [vmem:[%s979_s3 + $0x70] sm:$0xff]  ;;  %v132_v49 = vld [vmem:[%s979_s3 + $0x78] sm:$0xff] }
   0xc   :  { %604 = vmatpush3.bf16.msra.mxu0 %v603_v14  ;;  %v642_v50 = vpack.c.bf16 %v132_v49, %v131_v48  ;;  %v387_v51 = vld [vmem:[%s981_s2] ss:$0 sm:$0xff]  ;;  %v209_v56 = vld [vmem:[%s982_s4 + $0x8] sm:$0xff]  ;;  %v210_v57 = vld [vmem:[%s982_s4 + $0x10] sm:$0xff] }
   0xd   :  { %605 = vmatprep.subr.bf16.mxu0 %v699_v0  ;;  %v208_v55 = vld [vmem:[%s982_s4] sm:$0xff]  ;;  %v211_v59 = vld [vmem:[%s982_s4 + $0x18] sm:$0xff]  ;;  %v213_v62 = vld [vmem:[%s982_s4 + $0x28] sm:$0xff] }
   0xe   :  { %628 = vmatpush3.bf16.msra.mxu1 %v627_v24  ;;  %v645_v58 = vpack.c.bf16 %v209_v56, %v208_v55  ;;  %v648_v60 = vpack.c.bf16 %v211_v59, %v210_v57  ;;  %v212_v61 = vld [vmem:[%s982_s4 + $0x20] sm:$0xff]  ;;  %v214_v1 = vld [vmem:[%s982_s4 + $0x30] sm:$0xff]  ;;  %v215_v2 = vld [vmem:[%s982_s4 + $0x38] sm:$0xff] }
   0xf   :  { %629 = vmatprep.subr.bf16.mxu1 %v699_v0  ;;  %v651_v63 = vpack.c.bf16 %v213_v62, %v212_v61  ;;  %v654_v3 = vpack.c.bf16 %v215_v2, %v214_v1  ;;  %v216_v6 = vld [vmem:[%s982_s4 + $0x40] sm:$0xff]  ;;  %v217_v7 = vld [vmem:[%s982_s4 + $0x48] sm:$0xff]  ;;  %v218_v9 = vld [vmem:[%s982_s4 + $0x50] sm:$0xff] }
  0x10   :  { %607 = vmatpush3.bf16.msra.mxu0 %v606_v21  ;;  %v657_v8 = vpack.c.bf16 %v217_v7, %v216_v6  ;;  %v219_v10 = vld [vmem:[%s982_s4 + $0x58] sm:$0xff]  ;;  %v220_v12 = vld [vmem:[%s982_s4 + $0x60] sm:$0xff]  ;;  %v221_v13 = vld [vmem:[%s982_s4 + $0x68] sm:$0xff] }
  0x11   :  { %608 = vmatprep.subr.bf16.mxu0 %v699_v0  ;;  %v660_v11 = vpack.c.bf16 %v219_v10, %v218_v9  ;;  %v663_v14 = vpack.c.bf16 %v221_v13, %v220_v12  ;;  %v222_v15 = vld [vmem:[%s982_s4 + $0x70] sm:$0xff]  ;;  %v223_v16 = vld [vmem:[%s982_s4 + $0x78] sm:$0xff]  ;;  %v296_v18 = vld [vmem:[%s983_s5] sm:$0xff] }
  0x12   :  { %631 = vmatpush3.bf16.msra.mxu1 %v630_v30  ;;  %v666_v17 = vpack.c.bf16 %v223_v16, %v222_v15  ;;  %v297_v19 = vld [vmem:[%s983_s5 + $0x8] sm:$0xff]  ;;  %v298_v20 = vld [vmem:[%s983_s5 + $0x10] sm:$0xff]  ;;  %v299_v22 = vld [vmem:[%s983_s5 + $0x18] sm:$0xff] }
  0x13   :  { %632 = vmatprep.subr.bf16.mxu1 %v699_v0  ;;  %v669_v21 = vpack.c.bf16 %v297_v19, %v296_v18  ;;  %v672_v23 = vpack.c.bf16 %v299_v22, %v298_v20  ;;  %v300_v24 = vld [vmem:[%s983_s5 + $0x20] sm:$0xff]  ;;  %v301_v25 = vld [vmem:[%s983_s5 + $0x28] sm:$0xff]  ;;  %v303_v28 = vld [vmem:[%s983_s5 + $0x38] sm:$0xff] }
  0x14   :  { %610 = vmatpush3.bf16.msra.mxu0 %v609_v27  ;;  %v675_v26 = vpack.c.bf16 %v301_v25, %v300_v24  ;;  %v302_v27 = vld [vmem:[%s983_s5 + $0x30] sm:$0xff]  ;;  %v304_v30 = vld [vmem:[%s983_s5 + $0x40] sm:$0xff]  ;;  %v305_v31 = vld [vmem:[%s983_s5 + $0x48] sm:$0xff] }
  0x15   :  { %611 = vmatprep.subr.bf16.mxu0 %v699_v0  ;;  %v678_v29 = vpack.c.bf16 %v303_v28, %v302_v27  ;;  %v681_v32 = vpack.c.bf16 %v305_v31, %v304_v30  ;;  %v306_v37 = vld [vmem:[%s983_s5 + $0x50] sm:$0xff]  ;;  %v307_v38 = vld [vmem:[%s983_s5 + $0x58] sm:$0xff]  ;;  %v308_v40 = vld [vmem:[%s983_s5 + $0x60] sm:$0xff] }
  0x16   :  { %634 = vmatpush3.bf16.msra.mxu1 %v633_v36  ;;  %v309_v41 = vld [vmem:[%s983_s5 + $0x68] sm:$0xff]  ;;  %v310_v43 = vld [vmem:[%s983_s5 + $0x70] sm:$0xff]  ;;  %v311_v44 = vld [vmem:[%s983_s5 + $0x78] sm:$0xff] }
  0x17   :  { %635 = vmatprep.subr.bf16.mxu1 %v699_v0 }
  0x18   :  { %613 = vmatpush3.bf16.msra.mxu0 %v612_v33 }
  0x19   :  { %614 = vmatprep.subr.bf16.mxu0 %v699_v0 }
  0x1a   :  { %637 = vmatpush3.bf16.msra.mxu1 %v636_v42  ;;  %v687_v42 = vpack.c.bf16 %v309_v41, %v308_v40 }
  0x1b   :  { %638 = vmatprep.subr.bf16.mxu1 %v699_v0 }
  0x1c   :  { %616 = vmatpush3.bf16.msra.mxu0 %v615_v39  ;;  %v684_v39 = vpack.c.bf16 %v307_v38, %v306_v37 }
  0x1d   :  { %617 = vmatprep.subr.bf16.mxu0 %v699_v0 }
  0x1e   :  { %640 = vmatpush3.bf16.msra.mxu1 %v639_v46 }
  0x1f   :  { %641 = vmatprep.subr.bf16.mxu1 %v699_v0 }
  0x20   :  { %619 = vmatpush3.bf16.msra.mxu0 %v618_v45  ;;  %v690_v45 = vpack.c.bf16 %v311_v44, %v310_v43 }
  0x21   :  { %644 = vmatprep.subr.bf16.mxu0 %v699_v0 }
  0x22   :  { %643 = vmatpush3.bf16.msra.mxu1 %v642_v50 }
  0x23   :  { %489 = vmatmul.mubr.f32.vlgmr.msra.gmra.mrb[0].mxu0 %v23_v47  ;;  %668 = vmatprep.subr.bf16.mxu1 %v699_v0 }
  0x24   :  { %558 = vmatprep.mubr.msk.f32.mxu0 %vm700_vm0, %v701_v4  ;;  %646 = vmatpush3.bf16.msra.mxu0 %v645_v58 }
  0x25   :  { %647 = vmatprep.subr.bf16.mxu0 %v699_v0 }
  0x28   :  { %649 = vmatpush3.bf16.msra.mxu0 %v648_v60 }
  0x29   :  { %650 = vmatprep.subr.bf16.mxu0 %v699_v0 }
  0x2c   :  { %652 = vmatpush3.bf16.msra.mxu0 %v651_v63 }
  0x2d   :  { %653 = vmatprep.subr.bf16.mxu0 %v699_v0 }
  0x30   :  { %655 = vmatpush3.bf16.msra.mxu0 %v654_v3 }
  0x31   :  { %656 = vmatprep.subr.bf16.mxu0 %v699_v0 }
  0x34   :  { %658 = vmatpush3.bf16.msra.mxu0 %v657_v8 }
  0x35   :  { %659 = vmatprep.subr.bf16.mxu0 %v699_v0 }
  0x38   :  { %661 = vmatpush3.bf16.msra.mxu0 %v660_v11 }
  0x39   :  { %662 = vmatprep.subr.bf16.mxu0 %v699_v0 }
  0x3c   :  { %664 = vmatpush3.bf16.msra.mxu0 %v663_v14 }
  0x3d   :  { %665 = vmatprep.subr.bf16.mxu0 %v699_v0 }
  0x40   :  { %667 = vmatpush3.bf16.msra.mxu0 %v666_v17 }
  0xf6   :  { %v113_v52 = vpop.f32.mrb[0].mxu0 }
  0xf7   :  { %v114_v53 = vadd.f32 %v387_v51, %v113_v52  ;;  %v490_v54 = vpop.f32.mrb[1].mxu0 }
  0xf9   :  { %524 = vmatmul.mubr.f32.vlgmr.msra.gmra.mrb[0].mxu1 %v114_v53 }
  0xfa   :  { %593 = vmatprep.mubr.msk.f32.mxu1 %vm700_vm0, %v701_v4  ;;  %670 = vmatpush3.bf16.msra.mxu1 %v669_v21 }
  0xfb   :  { %671 = vmatprep.subr.bf16.mxu1 %v699_v0 }
  0xfe   :  { %673 = vmatpush3.bf16.msra.mxu1 %v672_v23 }
  0xff   :  { %674 = vmatprep.subr.bf16.mxu1 %v699_v0 }
 0x102   :  { %676 = vmatpush3.bf16.msra.mxu1 %v675_v26 }
 0x103   :  { %677 = vmatprep.subr.bf16.mxu1 %v699_v0 }
 0x106   :  { %679 = vmatpush3.bf16.msra.mxu1 %v678_v29 }
 0x107   :  { %680 = vmatprep.subr.bf16.mxu1 %v699_v0 }
 0x10a   :  { %682 = vmatpush3.bf16.msra.mxu1 %v681_v32 }
 0x10b   :  { %683 = vmatprep.subr.bf16.mxu1 %v699_v0 }
 0x10e   :  { %685 = vmatpush3.bf16.msra.mxu1 %v684_v39 }
 0x10f   :  { %686 = vmatprep.subr.bf16.mxu1 %v699_v0 }
 0x112   :  { %688 = vmatpush3.bf16.msra.mxu1 %v687_v42 }
 0x113   :  { %689 = vmatprep.subr.bf16.mxu1 %v699_v0 }
 0x116   :  { %691 = vmatpush3.bf16.msra.mxu1 %v690_v45 }
 0x1cc   :  { %v199_v4 = vpop.f32.mrb[0].mxu1 }
 0x1cd   :  { %v525_v5 = vpop.f32.mrb[1].mxu1  ;;  %203 = vmax.xlane.f32.xlu0 %v199_v4 }
 0x25a   :  { %v204_v33 = vpop.xlane.xlu0 %203 }
 0x25b   :  { %v205_v34 = vsub.f32 %v199_v4, %v204_v33 }
 0x25d   :  { %v206_v35 = vmul.f32 1.442695, %v205_v34 }
 0x25f   :  { %695 = vpow2.f32 %v206_v35 }
 0x269   :  { %v696_v36 = vpop.eup %695 }
 0x26a   :  { %559 = vmatmul.mubr.f32.vlgmr.msra.gmra.mrb[2].mxu0 %v696_v36 }
 0x33d   :  { %v290_v46 = vpop.f32.mrb[2].mxu0 }
 0x33e   :  { %697 = vrcp.f32 %v290_v46  ;;  %v560_v47 = vpop.f32.mrb[3].mxu0 }
 0x348   :  { %v698_v48 = vpop.eup %697 }
 0x349   :  { %v295_v49 = vmul.f32 %v698_v48, %v696_v36 }
 0x34b   :  { %594 = vmatmul.mubr.f32.vlgmr.msra.gmra.mrb[2].mxu1 %v295_v49 }
 0x41e   :  { %v378_v50 = vpop.f32.mrb[2].mxu1 }
 0x41f   :  { %382 = vst [vmem:[%s984_s6] sm:$0xff] %v378_v50  ;;  %v595_v51 = vpop.f32.mrb[3].mxu1 }

</bundles_post_ra>
